<compile_context>
chip_gen: v6e
topology: v6e:2x2x1
jax: 0.10.0
libtpu: 0.0.40
codegen_flags: <defaults>
</compile_context>

<pallas_src>
import jax
import jax.numpy as jnp
from jax import lax
from jax.experimental import pallas as pl
from jax.experimental.pallas import tpu as pltpu

EPS = 1e-05

# Leading grid axis size: shards batch tiles across TensorCores on multi-TC
# chips (v7x). Harmless (serial) on single-TC chips.
NUM_CORE_SPLITS = 2


def _sublane_multiple(*dtypes):
    """Sublane packing requirement for the row-block size (f32:8 bf16:16 i8:32)."""
    m = 8
    for dt in dtypes:
        bits = jnp.dtype(dt).itemsize * 8
        m = max(m, 256 // bits)
    return m


def _vmem_limit_bytes():
    """Generation-aware scoped-VMEM limit (leave pipeline/compiler headroom)."""
    cap = 64 * 1024 * 1024
    try:
        info = pltpu.get_tpu_info()
        cap = int(getattr(info, "vmem_capacity_bytes", cap))
    except Exception:
        pass
    # ~48 MiB on v7x (64 MiB physical); capped at 64 MiB on v5e/v6e (128 MiB)
    # since these tiles never need more.
    return min(cap * 3 // 4, 64 * 1024 * 1024)


def _tile_footprint_bytes(tb, c, in_item, t_item):
    """2 pipeline buffers per input + ~5 tile-sized f32 temporaries."""
    pipeline = 2 * tb * c * (in_item + t_item)
    temps = 5 * tb * c * 4
    return pipeline + temps


def _make_kernel(true_b, tb, tiles_per_core, eps_guard, needs_mask):
    full_tiles = true_b // tb  # tiles strictly before this index have only valid rows

    def kernel(x_ref, t_ref, o_ref):
        c = pl.program_id(0)
        i = pl.program_id(1)

        @pl.when(i == 0)
        def _init():
            o_ref[...] = jnp.zeros_like(o_ref)

        x = x_ref[...].astype(jnp.float32)   # (TB, C)
        t = t_ref[...].astype(jnp.float32)   # (TB, C)

        # Numerically stable softmax statistics along the class axis (lanes).
        # TODO(synk): if a bundle dump shows VALU saturating, these axis=1
        # reductions can be offloaded to the (idle) MXU as dot(tile, ones).
        m = jnp.max(x, axis=1, keepdims=True)            # (TB, 1)
        e = jnp.exp(x - m)                               # (TB, C)  EUP
        denom = jnp.sum(e, axis=1, keepdims=True)        # (TB, 1)
        inv_denom = pl.reciprocal(denom, approx=True)    # (TB, 1)  EUP vrcp

        k = jnp.sum(t, axis=1, keepdims=True)            # (TB, 1)

        if eps_guard:
            # Exact module semantics: full-tile log(EPS + softmax).
            sm = e * inv_denom
            sumprobs = jnp.sum(t * sm, axis=1, keepdims=True)
            logprobs_sum = jnp.sum(t * jnp.log(EPS + sm), axis=1, keepdims=True)
        else:
            # Log-softmax identity: log(sm) = (x - m) - log(denom).
            # Only per-row transcendentals remain -> ~2x fewer EUP ops, and the
            # full-tile sm array is never materialized.
            sumprobs = jnp.sum(t * e, axis=1, keepdims=True) * inv_denom
            logprobs_sum = (jnp.sum(t * (x - m), axis=1, keepdims=True)
                            - k * jnp.log(denom))

        invprob = jnp.maximum(jnp.float32(EPS), 1.0 - sumprobs)     # (TB, 1)
        loss = (1.0 - sumprobs) * (jnp.log(invprob) - logprobs_sum / k) * k

        if needs_mask:
            g = c * tiles_per_core + i   # global batch-tile index

            @pl.when(g < full_tiles)     # fully-valid tile: unmasked fast path
            def _acc_fast():
                o_ref[...] += jnp.sum(loss, axis=0, keepdims=True).reshape(1, 1, 1)

            @pl.when(g >= full_tiles)    # partial / phantom tile: mask padded rows
            def _acc_masked():
                row = g * tb + lax.broadcasted_iota(jnp.int32, (tb, 1), 0)
                # select keeps NaN/Inf from garbage rows out of the accumulator
                masked = jnp.where(row < true_b, loss, 0.0)
                o_ref[...] += jnp.sum(masked, axis=0, keepdims=True).reshape(1, 1, 1)
        else:
            o_ref[...] += jnp.sum(loss, axis=0, keepdims=True).reshape(1, 1, 1)

    return kernel


def log_prp_loss(inputs, targets, block_rows=None, eps_guard=True):
    """PRP loss forward. inputs/targets: (B, C). Returns scalar f32 loss.

    inputs may be f32/bf16, targets may be f32/bf16/int8 (multi-hot); the
    kernel upcasts to f32 in VMEM, so narrow dtypes cut HBM traffic.
    """
    B, C = inputs.shape
    assert targets.shape == (B, C)

    # Lane-dense class axis: pad C to a multiple of 128.  Pads are exact no-ops
    # (exp(-1e9) underflows to 0 in the softmax, padded targets are 0).
    C_pad = ((C + 127) // 128) * 128
    if C_pad != C:
        inputs = jnp.pad(inputs, ((0, 0), (0, C_pad - C)), constant_values=-1e9)
        targets = jnp.pad(targets, ((0, 0), (0, C_pad - C)))
        C = C_pad

    in_item = jnp.dtype(inputs.dtype).itemsize
    t_item = jnp.dtype(targets.dtype).itemsize
    mult = _sublane_multiple(inputs.dtype, targets.dtype)
    vmem_limit = _vmem_limit_bytes()

    if block_rows is None:
        # ~2-4 MiB of f32 work per tile: the measured HBM-roofline curve
        # plateaus here; bigger tiles buy <2% while the f32 temporaries
        # multiply the footprint 3-5x.
        rows = (3 * 1024 * 1024) // max(1, C * 4)
        block_rows = max(mult, (rows // mult) * mult)

    if block_rows >= B:
        tb = B                                    # single tile: block == full dims
    else:
        tb = max(mult, (block_rows // mult) * mult)

    # Shrink the tile until double-buffered inputs + f32 temps fit the limit.
    while tb > mult and _tile_footprint_bytes(tb, C, in_item, t_item) > vmem_limit:
        tb = max(mult, ((tb // 2) // mult) * mult)
    if _tile_footprint_bytes(tb, C, in_item, t_item) > vmem_limit:
        raise ValueError(
            f"log_prp_loss: class count C={C} is too large for a single-tile "
            f"softmax under the {vmem_limit // 2**20} MiB VMEM budget; a "
            "C-tiled two-pass softmax path would be required.")

    num_tiles = pl.cdiv(B, tb)
    splits = min(NUM_CORE_SPLITS, num_tiles)
    tiles_per_core = pl.cdiv(num_tiles, splits)
    # True when the (splits x tiles_per_core) tile grid over-covers the batch
    # (partial last tile and/or phantom tiles from the core split).
    needs_mask = (splits * tiles_per_core * tb) != B
    last_tile = num_tiles - 1

    def in_index_map(c, i):
        # Clamp phantom tiles (core split rounding) to the last real block;
        # their rows are >= B and get masked to zero inside the kernel.
        return (jnp.minimum(c * tiles_per_core + i, last_tile), 0)

    kernel = _make_kernel(B, tb, tiles_per_core, eps_guard, needs_mask)

    partials = pl.pallas_call(
        kernel,
        out_shape=jax.ShapeDtypeStruct((splits, 1, 1), jnp.float32),
        grid_spec=pltpu.PrefetchScalarGridSpec(
            num_scalar_prefetch=0,
            grid=(splits, tiles_per_core),
            in_specs=[
                pl.BlockSpec((tb, C), in_index_map),
                pl.BlockSpec((tb, C), in_index_map),
            ],
            # Per-core-split partial sum; resident across the "arbitrary" axis.
            out_specs=pl.BlockSpec((1, 1, 1), lambda c, i: (c, 0, 0)),
        ),
        compiler_params=pltpu.CompilerParams(
            dimension_semantics=("parallel", "arbitrary"),
            vmem_limit_bytes=vmem_limit,
        ),
    )(inputs, targets)

    return jnp.sum(partials) / B


def _reference(inputs, targets, eps_guard=True):
    """Pure-JAX reference mirroring the PyTorch forward."""
    x = inputs.astype(jnp.float32)
    t = targets.astype(jnp.float32)
    sm = jax.nn.softmax(x, axis=1)
    k = t.sum(1)
    sumprobs = (t * sm).sum(1)
    if eps_guard:
        logprobs = (t * jnp.log(EPS + sm)).sum(1)
    else:
        logprobs = (t * jnp.log(sm)).sum(1)
    invprob = jnp.maximum(EPS, 1.0 - sumprobs)
    loss = (1.0 - sumprobs) * (jnp.log(invprob) - logprobs / k) * k
    return jnp.mean(loss)


if __name__ == "__main__":
    key = jax.random.PRNGKey(0)
    k1, k2, k3, k4 = jax.random.split(key, 4)

    # Tolerances are slightly looser than pure-f32 parity because the kernel
    # uses the approximate EUP reciprocal for the softmax normalization and
    # re-associates the batch reduction.

    # Case 1: exact-EPS path, f32 inputs, lane-dense C, evenly tiled batch
    # (also exercises the phantom tile created by the 2-way core split).
    B1, C1 = 48, 128
    x1 = jax.random.normal(k1, (B1, C1), dtype=jnp.float32)
    t1 = (jax.random.uniform(k2, (B1, C1)) < 0.25).astype(jnp.float32)
    t1 = t1.at[:, 0].set(1.0)                 # >= 1 positive label per row (k > 0)

    loss1 = log_prp_loss(x1, t1, block_rows=16, eps_guard=True)
    jax.block_until_ready(loss1)
    ref1 = _reference(x1, t1, eps_guard=True)
    assert jnp.allclose(loss1, ref1, rtol=5e-3, atol=5e-3), (loss1, ref1)

    # Case 2: log-softmax-identity path, narrow HBM dtypes (bf16 logits,
    # int8 multi-hot targets), C not a multiple of 128 (exercises the lane
    # pad) and B not a multiple of the tile (exercises the padded-row mask).
    B2, C2 = 50, 96
    x2 = jax.random.normal(k3, (B2, C2), dtype=jnp.float32).astype(jnp.bfloat16)
    t2f = (jax.random.uniform(k4, (B2, C2)) < 0.25).astype(jnp.float32)
    t2f = t2f.at[:, 0].set(1.0)
    t2 = t2f.astype(jnp.int8)

    loss2 = log_prp_loss(x2, t2, block_rows=16, eps_guard=False)
    jax.block_until_ready(loss2)
    ref2 = _reference(x2.astype(jnp.float32), t2f, eps_guard=False)
    assert jnp.allclose(loss2, ref2, rtol=5e-3, atol=5e-3), (loss2, ref2)

    print("KERNEL_OK")
</pallas_src>

<mosaic_0001>
module attributes {stable_mosaic.version = 11 : i64} {
  func.func @kernel(%arg0: i32, %arg1: i32, %arg2: memref<16x128xf32, #tpu.memory_space<vmem>>, %arg3: memref<16x128xf32, #tpu.memory_space<vmem>>, %arg4: memref<1x1x1xf32, #tpu.memory_space<vmem>>) attributes {dimension_semantics = [#tpu.dimension_semantics<parallel>, #tpu.dimension_semantics<arbitrary>], iteration_bounds = array<i64: 2, 2>, scalar_prefetch = 0 : i64, scratch_operands = 0 : i64, tpu.core_type = #tpu.core_type<tc>, window_params = [{transform_indices = @transform_0, window_bounds = array<i64: 16, 128>}, {transform_indices = @transform_1, window_bounds = array<i64: 16, 128>}, {transform_indices = @transform_2, window_bounds = array<i64: 1, 1, 1>}]} {
    %c0_i32 = arith.constant 0 : i32
    %0 = arith.cmpi eq, %arg1, %c0_i32 : i32
    %1 = arith.extui %0 : i1 to i32
    %c0_i32_0 = arith.constant 0 : i32
    %2 = arith.cmpi ne, %1, %c0_i32_0 : i32
    scf.if %2 {
      %cst_15 = arith.constant 0.000000e+00 : f32
      %45 = vector.broadcast %cst_15 : f32 to vector<1x1x1xf32>
      %c0_16 = arith.constant 0 : index
      %c0_17 = arith.constant 0 : index
      %c0_18 = arith.constant 0 : index
      %46 = vector.load %arg4[%c0_16, %c0_17, %c0_18] : memref<1x1x1xf32, #tpu.memory_space<vmem>>, vector<1x1x1xf32>
      tpu.vector_store %arg4[%c0_16, %c0_17, %c0_18], %45 {strides = array<i32>} : memref<1x1x1xf32, #tpu.memory_space<vmem>>, vector<1x1x1xf32>,
    } else {
    }
    %c0 = arith.constant 0 : index
    %c0_1 = arith.constant 0 : index
    %3 = vector.load %arg2[%c0, %c0_1] : memref<16x128xf32, #tpu.memory_space<vmem>>, vector<16x128xf32>
    %c0_2 = arith.constant 0 : index
    %c0_3 = arith.constant 0 : index
    %4 = vector.load %arg3[%c0_2, %c0_3] : memref<16x128xf32, #tpu.memory_space<vmem>>, vector<16x128xf32>
    %cst = arith.constant dense<0xFF800000> : vector<16xf32>
    %5 = vector.multi_reduction <maximumf>, %3, %cst [1] : vector<16x128xf32> to vector<16xf32>
    %6 = vector.shape_cast %5 : vector<16xf32> to vector<16x1xf32>
    %7 = vector.broadcast %6 : vector<16x1xf32> to vector<16x128xf32>
    %8 = arith.subf %3, %7 : vector<16x128xf32>
    %9 = math.exp %8 : vector<16x128xf32>
    %cst_4 = arith.constant dense<0.000000e+00> : vector<16xf32>
    %10 = vector.multi_reduction <add>, %9, %cst_4 [1] : vector<16x128xf32> to vector<16xf32>
    %11 = vector.shape_cast %10 : vector<16xf32> to vector<16x1xf32>
    %12 = tpu.reciprocal %11 {approx = true} : vector<16x1xf32> -> vector<16x1xf32>
    %cst_5 = arith.constant dense<0.000000e+00> : vector<16xf32>
    %13 = vector.multi_reduction <add>, %4, %cst_5 [1] : vector<16x128xf32> to vector<16xf32>
    %14 = vector.shape_cast %13 : vector<16xf32> to vector<16x1xf32>
    %15 = vector.broadcast %12 : vector<16x1xf32> to vector<16x128xf32>
    %16 = arith.mulf %9, %15 : vector<16x128xf32>
    %17 = arith.mulf %4, %16 : vector<16x128xf32>
    %cst_6 = arith.constant dense<0.000000e+00> : vector<16xf32>
    %18 = vector.multi_reduction <add>, %17, %cst_6 [1] : vector<16x128xf32> to vector<16xf32>
    %19 = vector.shape_cast %18 : vector<16xf32> to vector<16x1xf32>
    %cst_7 = arith.constant 9.99999974E-6 : f32
    %20 = vector.broadcast %cst_7 : f32 to vector<16x128xf32>
    %21 = arith.addf %20, %16 : vector<16x128xf32>
    %22 = math.log %21 : vector<16x128xf32>
    %23 = arith.mulf %4, %22 : vector<16x128xf32>
    %cst_8 = arith.constant dense<0.000000e+00> : vector<16xf32>
    %24 = vector.multi_reduction <add>, %23, %cst_8 [1] : vector<16x128xf32> to vector<16xf32>
    %25 = vector.shape_cast %24 : vector<16xf32> to vector<16x1xf32>
    %cst_9 = arith.constant 1.000000e+00 : f32
    %26 = vector.broadcast %cst_9 : f32 to vector<16x1xf32>
    %27 = arith.subf %26, %19 : vector<16x1xf32>
    %cst_10 = arith.constant 9.99999974E-6 : f32
    %28 = vector.broadcast %cst_10 : f32 to vector<16x1xf32>
    %29 = arith.maximumf %28, %27 : vector<16x1xf32>
    %cst_11 = arith.constant 1.000000e+00 : f32
    %30 = vector.broadcast %cst_11 : f32 to vector<16x1xf32>
    %31 = arith.subf %30, %19 : vector<16x1xf32>
    %32 = math.log %29 : vector<16x1xf32>
    %33 = arith.divf %25, %14 : vector<16x1xf32>
    %34 = arith.subf %32, %33 : vector<16x1xf32>
    %35 = arith.mulf %31, %34 : vector<16x1xf32>
    %36 = arith.mulf %35, %14 : vector<16x1xf32>
    %c2_i32 = arith.constant 2 : i32
    %37 = arith.muli %arg0, %c2_i32 : i32
    %38 = arith.addi %37, %arg1 : i32
    %c3_i32 = arith.constant 3 : i32
    %39 = arith.cmpi slt, %38, %c3_i32 : i32
    %40 = arith.extui %39 : i1 to i32
    %c0_i32_12 = arith.constant 0 : i32
    %41 = arith.cmpi ne, %40, %c0_i32_12 : i32
    scf.if %41 {
      %c0_15 = arith.constant 0 : index
      %c0_16 = arith.constant 0 : index
      %c0_17 = arith.constant 0 : index
      %45 = vector.load %arg4[%c0_15, %c0_16, %c0_17] : memref<1x1x1xf32, #tpu.memory_space<vmem>>, vector<1x1x1xf32>
      %cst_18 = arith.constant dense<0.000000e+00> : vector<1xf32>
      %46 = vector.multi_reduction <add>, %36, %cst_18 [0] : vector<16x1xf32> to vector<1xf32>
      %47 = vector.shape_cast %46 : vector<1xf32> to vector<1x1xf32>
      %48 = vector.shape_cast %47 : vector<1x1xf32> to vector<1x1x1xf32>
      %49 = arith.addf %45, %48 : vector<1x1x1xf32>
      %c0_19 = arith.constant 0 : index
      %c0_20 = arith.constant 0 : index
      %c0_21 = arith.constant 0 : index
      %50 = vector.load %arg4[%c0_19, %c0_20, %c0_21] : memref<1x1x1xf32, #tpu.memory_space<vmem>>, vector<1x1x1xf32>
      tpu.vector_store %arg4[%c0_19, %c0_20, %c0_21], %49 {strides = array<i32>} : memref<1x1x1xf32, #tpu.memory_space<vmem>>, vector<1x1x1xf32>,
    } else {
    }
    %c3_i32_13 = arith.constant 3 : i32
    %42 = arith.cmpi sge, %38, %c3_i32_13 : i32
    %43 = arith.extui %42 : i1 to i32
    %c0_i32_14 = arith.constant 0 : i32
    %44 = arith.cmpi ne, %43, %c0_i32_14 : i32
    scf.if %44 {
      %c16_i32 = arith.constant 16 : i32
      %45 = arith.muli %38, %c16_i32 : i32
      %46 = tpu.iota {dimensions = array<i32: 0>} : vector<16x1xi32>
      %47 = vector.broadcast %45 : i32 to vector<16x1xi32>
      %48 = arith.addi %47, %46 : vector<16x1xi32>
      %c48_i32 = arith.constant 48 : i32
      %49 = vector.broadcast %c48_i32 : i32 to vector<16x1xi32>
      %50 = arith.cmpi slt, %48, %49 : vector<16x1xi32>
      %cst_15 = arith.constant 0.000000e+00 : f32
      %51 = vector.broadcast %cst_15 : f32 to vector<16x1xf32>
      %52 = arith.select %50, %36, %51 : vector<16x1xi1>, vector<16x1xf32>
      %c0_16 = arith.constant 0 : index
      %c0_17 = arith.constant 0 : index
      %c0_18 = arith.constant 0 : index
      %53 = vector.load %arg4[%c0_16, %c0_17, %c0_18] : memref<1x1x1xf32, #tpu.memory_space<vmem>>, vector<1x1x1xf32>
      %cst_19 = arith.constant dense<0.000000e+00> : vector<1xf32>
      %54 = vector.multi_reduction <add>, %52, %cst_19 [0] : vector<16x1xf32> to vector<1xf32>
      %55 = vector.shape_cast %54 : vector<1xf32> to vector<1x1xf32>
      %56 = vector.shape_cast %55 : vector<1x1xf32> to vector<1x1x1xf32>
      %57 = arith.addf %53, %56 : vector<1x1x1xf32>
      %c0_20 = arith.constant 0 : index
      %c0_21 = arith.constant 0 : index
      %c0_22 = arith.constant 0 : index
      %58 = vector.load %arg4[%c0_20, %c0_21, %c0_22] : memref<1x1x1xf32, #tpu.memory_space<vmem>>, vector<1x1x1xf32>
      tpu.vector_store %arg4[%c0_20, %c0_21, %c0_22], %57 {strides = array<i32>} : memref<1x1x1xf32, #tpu.memory_space<vmem>>, vector<1x1x1xf32>,
    } else {
    }
    return
  }
  func.func @transform_0(%arg0: i32, %arg1: i32) -> (i32, i32) {
    %c2_i32 = arith.constant 2 : i32
    %0 = arith.muli %arg0, %c2_i32 : i32
    %1 = arith.addi %0, %arg1 : i32
    %c2_i32_0 = arith.constant 2 : i32
    %2 = arith.minsi %1, %c2_i32_0 : i32
    %c0_i32 = arith.constant 0 : i32
    %c0_i32_1 = arith.constant 0 : i32
    return %2, %c0_i32 : i32, i32
  }
  func.func @transform_1(%arg0: i32, %arg1: i32) -> (i32, i32) {
    %c2_i32 = arith.constant 2 : i32
    %0 = arith.muli %arg0, %c2_i32 : i32
    %1 = arith.addi %0, %arg1 : i32
    %c2_i32_0 = arith.constant 2 : i32
    %2 = arith.minsi %1, %c2_i32_0 : i32
    %c0_i32 = arith.constant 0 : i32
    %c0_i32_1 = arith.constant 0 : i32
    return %2, %c0_i32 : i32, i32
  }
  func.func @transform_2(%arg0: i32, %arg1: i32) -> (i32, i32, i32) {
    %c0_i32 = arith.constant 0 : i32
    %c0_i32_0 = arith.constant 0 : i32
    %c0_i32_1 = arith.constant 0 : i32
    return %arg0, %c0_i32, %c0_i32_0 : i32, i32, i32
  }
}

</mosaic_0001>

<bundles_post_ra>
// kernel: tpu_custom_call.1
= control target key start
LH: loop header
LB: loop body
LE: loop exit
PB: predicated region body
PF: predicated region fallthrough
CT: control target
= control target key end

     0   :  { %s899_s0 = inlined_call_operand.hbm [shape: f32[48,128], index: 0, kind: input, shape index: {}]   ;;  %s900_s1 = inlined_call_operand.hbm [shape: f32[48,128], index: 1, kind: input, shape index: {}]   ;;  %s901_s2 = inlined_call_operand.vmem [shape: f32[2,1,1], index: 2, kind: output, shape index: {}]  }
   0x1   :  { %902 = sst [smem:[#allocation8_spill]] %s899_s0 }
   0x2   :  { %7 = vsyncpa [#allocation3], 0 }
   0x3   :  { %9 = vsyncpa [#allocation3 + $0x1], 0 }
   0x4   :  { %10 = vsyncpa [#allocation5], 0 }
   0x5   :  { %12 = vsyncpa [#allocation5 + $0x1], 0  ;;  %s725_s9 = smov 0   ;;  %s727_s10 = smov 0  }
   0x6   :  { %s729_s11 = smov 0   ;;  %s731_s12 = smov 0  }
   0x7   :  { %s733_s13 = smov 0   ;;  %s735_s14 = smov 0  }
   0x8   :  { %s737_s15 = smov 0   ;;  %s739_s16 = smov 0  }
   0x9 LB: > { %s450_s17 = sadd.s32 4294967295, %s703_s16   ;;  %s27_s18 = sadd.s32 1, %s695_s14  ;;  %s703_s16 = sphi %s739_s16, %s18_s16   ;;  %s699_s15 = sphi %s737_s15, %s914_s15   ;;  %s695_s14 = sphi %s735_s14, %s913_s14   ;;  %s691_s13 = sphi %s733_s13, %s912_s13   ;;  %s687_s12 = sphi %s731_s12, %s911_s12   ;;  %s683_s11 = sphi %s729_s11, %s910_s11   ;;  %s679_s10 = sphi %s727_s10, %s909_s10   ;;  %s675_s9 = sphi %s725_s9, %s908_s9  }
   0xa   : > { %p28_p0 = scmp.ge.s32.totalorder %s27_s18, 2  ;;  %s30_s19 = sadd.s32 1, %s699_s15 }
   0xb   : > { %s452_s20 = sshll.u32 %s699_s15, 1  ;;  %s45_s21 = sadd.s32 1, %s683_s11 }
   0xc   : > { %s916_s18 = smov (%p28_p0, %s27_s18), 0  ;;  %s918_s19 = smov (!%p28_p0, %s30_s19), %s699_s15 }
   0xd   : > { %s35_s22 = sadd.s32 %s695_s14, %s452_s20  ;;  %p52_p1 = scmp.ne.s32.totalorder %s683_s11, %s679_s10 }
   0xe   : > { %p32_p2 = scmp.ge.s32.totalorder %s918_s19, 2  ;;  %p36_p3 = scmp.lt.s32.totalorder %s35_s22, 2 }
   0xf   : > { %p53_p4 = scmp.eq.s32.totalorder %s703_s16, 0  ;;  %p58_p5 = scmp.ne.s32.totalorder %s679_s10, %s675_s9 }
  0x10   : > { %s920_s19 = smov (%p32_p2, %s918_s19), 0  ;;  %s922_s22 = smov (!%p36_p3, %s35_s22), 2 }
  0x11   : > { %s453_s23 = sshll.u32 %s920_s19, 1  ;;  %p781_p6 = por %p53_p4, %p52_p1 }
  0x12   : > { %s39_s25 = sadd.s32 %s453_s23, %s916_s18  ;;  %p59_p7 = scmp.eq.s32.totalorder %s450_s17, 0 }
  0x13   : > { %p40_p8 = scmp.lt.s32.totalorder %s39_s25, 2  ;;  %p489_p10 = scmp.lt.s32.totalorder %s703_s16, 4 }
  0x14   : > { %p786_p9 = por %p59_p7, %p58_p5  ;;  %s792_s27 = sand.u32 1, %s683_s11  }
  0x15   : > { %s924_s25 = smov (!%p40_p8, %s39_s25), 2  ;;  %s476_s28 = sshll.u32 %s922_s22, 8 }
  0x16   : > { %s42_s29 = ssub.s32 %s922_s22, %s924_s25  ;;  %s458_s30 = sshll.u32 %s792_s27, 4 }
  0x17   : > { %p43_p11 = scmp.eq.s32.totalorder %s42_s29, 0  ;;  %s905_s0 = sld [smem:[#allocation8_spill]] }
  0x18   : > { %s146_s7 = scalar_lea.vmem [#allocation2], %s458_s30  ;;  %p809_p12 = pnand %p489_p10, %p781_p6 }
  0x19   : > { %s803_s6 = scalar_select %p43_p11, %s683_s11, %s45_s21  }
  0x1a   : > { %s157_s8 = sshll.u32 %s146_s7, 4  ;;  %s143_s17 = scalar_lea.sflag [#allocation3], %s792_s27  ;;  %s158_s8 = int_to_ptr.vmem [resolvable:$true] %s157_s8 }
  0x1b   : > { %p579_p13 = pneg %p809_p12  ;;  %s590_s20 = scalar_lea.vmem %s158_s8, 256 }
  0x1c   : > { %p591_p0 = scmp.ne.s32.totalorder %s158_s8, %s590_s20  ;;  %s705_s21 = smov [#allocation2]  }
  0x1d   : > { %s156_s5 = scalar_lea.hbm %s905_s0, %s476_s28  ;;  %s595_s23 = sshll.u32 %s705_s21, 4  ;;  %s596_s23 = int_to_ptr.vmem [resolvable:$false] %s595_s23 }
  0x1e   : > { %p593_p1 = pnand %p591_p0, %p579_p13  ;;  %s597_s24 = scalar_lea.vmem %s596_s23, 512 }
  0x1f   : > { %p598_p3 = scmp.lt.s32.totalorder %s158_s8, %s596_s23  ;;  %p599_p4 = scmp.lt.s32.totalorder %s597_s24, %s590_s20 }
  0x20   : > { %p594_p2 = pneg %p593_p1 }
  0x21   : > { %p600_p5 = por %p599_p4, %p598_p3 }
  0x23   : > { %p601_p6 = pnand %p600_p5, %p594_p2 }
  0x25   : > { %604 = shalt.err (!%p601_p6)
}
  0x26   : > { %s706_s25 = smov 128   ;;  %s707_s29 = smov 8  }
  0x27   : > { %485 = dma.hbm_to_vmem [thread:$0]  (!%p809_p12), %s156_s5, 256, %s158_s8, %s143_s17, %s706_s25, %s706_s25, %s707_s29  }
  0x28   : > { %p466_p7 = scmp.ge.s32.totalorder %s703_s16, 1  ;;  %p190_p8 = scmp.lt.s32.totalorder %s703_s16, 5 }
  0x29   : > { %s181_s20 = scalar_lea.hbm %s900_s1, %s476_s28  ;;  %s171_s21 = scalar_lea.vmem [#allocation4], %s458_s30 }
  0x2a   : > { %p823_p10 = pnand %p466_p7, %p190_p8  ;;  %s182_s23 = sshll.u32 %s171_s21, 4  ;;  %s183_s23 = int_to_ptr.vmem [resolvable:$true] %s182_s23 }
  0x2b   : > { %s168_s24 = scalar_lea.sflag [#allocation5], %s792_s27  ;;  %s618_s0 = scalar_lea.vmem %s183_s23, 256 }
  0x2c   : > { %p619_p11 = scmp.ne.s32.totalorder %s183_s23, %s618_s0  ;;  %s708_s5 = smov [#allocation4]  }
  0x2d   : > { %s623_s8 = sshll.u32 %s708_s5, 4  ;;  %s624_s8 = int_to_ptr.vmem [resolvable:$false] %s623_s8 }
  0x2e   : > { %p621_p0 = pnand %p619_p11, %p579_p13  ;;  %s625_s17 = scalar_lea.vmem %s624_s8, 512 }
  0x2f   : > { %p626_p2 = scmp.lt.s32.totalorder %s183_s23, %s624_s8  ;;  %p627_p3 = scmp.lt.s32.totalorder %s625_s17, %s618_s0 }
  0x30   : > { %p622_p1 = pneg %p621_p0 }
  0x31   : > { %p628_p4 = por %p627_p3, %p626_p2 }
  0x33   : > { %p629_p5 = pnand %p628_p4, %p622_p1 }
  0x35   : > { %632 = shalt.err (!%p629_p5)
}
  0x36   : > { %488 = dma.hbm_to_vmem [thread:$0]  (!%p809_p12), %s181_s20, 256, %s183_s23, %s168_s24, %s706_s25, %s706_s25, %s707_s29  }
  0x37   : > { %194 = sbr.rel (%p823_p10) target bundleno = 606 (0x25e), region = 28  ;;  %s196_s22 = sand.u32 (!%p823_p10), 1, %s679_s10  }
  0x38   : > { %s467_s27 = sshll.u32 (!%p823_p10), %s196_s22, 4  ;;  %s197_s28 = scalar_lea.sflag (!%p823_p10), [#allocation3], %s196_s22 }
  0x39   : > { %s200_s30 = scalar_lea.vmem (!%p823_p10), [#allocation2], %s467_s27 }
  0x3c   : > { %666 = dma.done.wait (%p786_p9), %s197_s28, 256  }
  0x3d   : > { %668 = vsyncadd (%p786_p9), %s197_s28, 4294967040  ;;  %s206_s0 = scalar_lea.sflag [#allocation5], %s196_s22  ;;  %s847_s4 = scalar_lea.vmem [#allocation4], %s467_s27 }
  0x3e   : > { %670 = dma.done.wait (%p786_p9), %s206_s0, 256  }
  0x3f   : > { %672 = vsyncadd (%p786_p9), %s206_s0, 4294967040  ;;  %p243_p12 = scmp.lt.s32.totalorder %s691_s13, 1  ;;  %p469_p13 = scmp.ne.s32.totalorder %s687_s12, 0 }
  0x41   : > { %s244_s9 = scalar_select %p243_p12, %s691_s13, 1 }
  0x42   : > { %249 = sbr.rel (%p469_p13) target bundleno = 73 (0x49), region = 40 }
  0x43   : > { %s858_s3 = scalar_lea.vmem %s901_s2, %s244_s9 }
  0x47   : > { %vm250_vm0 = vcmask 0   ;;  %v709_v0 = vmov 0.0  }
  0x48   : > { %251 = vst.msk [vmem:[%s858_s3] sm:$0x1] %vm250_vm0, %v709_v0 }
  0x49 PF: > { %v252_v1 = vld [vmem:[%s200_s30] sm:$0xff]  ;;  %v253_v2 = vld [vmem:[%s200_s30 + $0x8] sm:$0xff]  ;;  %s470_s26 = sshll.u32 %s691_s13, 1 }
  0x4a   : > { %256 = vmax.xlane.f32.xlu0 %v252_v1  ;;  %v254_v14 = vld [vmem:[%s847_s4] sm:$0xff]  ;;  %v255_v19 = vld [vmem:[%s847_s4 + $0x8] sm:$0xff]  ;;  %s866_s7 = sadd.s32 %s687_s12, %s470_s26 }
  0x4b   : > { %p471_p9 = scmp.ge.s32.totalorder %s866_s7, 3 }
  0x4e   : > { %258 = vmax.xlane.f32.xlu0 %v253_v2 }
  0xd3   : > { %v257_v3 = vpop.xlane.xlu0 %256 }
  0xd4   : > { %v260_v4 = vsub.f32 %v252_v1, %v257_v3 }
  0xd6   : > { %v262_v5 = vmul.f32 1.442695, %v260_v4 }
  0xd7   : > { %v259_v6 = vpop.xlane.xlu0 %258 }
  0xd8   : > { %557 = vpow2.f32 %v262_v5  ;;  %v261_v7 = vsub.f32 %v253_v2, %v259_v6 }
  0xda   : > { %v264_v8 = vmul.f32 1.442695, %v261_v7 }
  0xdc   : > { %559 = vpow2.f32 %v264_v8 }
  0xe5   : > { %v558_v9 = vpop.eup %557 }
  0xe6   : > { %266 = vadd.xlane.f32.xlu1 %v558_v9 }
  0xe9   : > { %v560_v10 = vpop.eup %559 }
  0xea   : > { %268 = vadd.xlane.f32.xlu1 %v560_v10 }
 0x16f   : > { %v267_v11 = vpop.xlane.xlu1 %266 }
 0x170   : > { %561 = vrcp.f32 %v267_v11 }
 0x173   : > { %v269_v12 = vpop.xlane.xlu1 %268 }
 0x174   : > { %563 = vrcp.f32 %v269_v12 }
 0x17d   : > { %v562_v13 = vpop.eup %561 }
 0x17e   : > { %v276_v15 = vmul.f32 %v562_v13, %v558_v9 }
 0x180   : > { %v278_v16 = vmul.f32 %v276_v15, %v254_v14  ;;  %v284_v17 = vadd.f32 1e-05, %v276_v15 }
 0x181   : > { %v564_v18 = vpop.eup %563 }
 0x182   : > { %565 = vlog2.f32 %v284_v17  ;;  %280 = vadd.xlane.f32.xlu0 %v278_v16  ;;  %v277_v20 = vmul.f32 %v564_v18, %v560_v10 }
 0x184   : > { %v279_v21 = vmul.f32 %v277_v20, %v255_v19  ;;  %v285_v22 = vadd.f32 1e-05, %v277_v20 }
 0x186   : > { %272 = vadd.xlane.f32.xlu0 %v254_v14  ;;  %567 = vlog2.f32 %v285_v22  ;;  %282 = vadd.xlane.f32.xlu1 %v279_v21 }
 0x18a   : > { %274 = vadd.xlane.f32.xlu1 %v255_v19 }
 0x18f   : > { %v566_v23 = vpop.eup %565 }
 0x190   : > { %v287_v24 = vmul.f32 0.6931472, %v566_v23 }
 0x192   : > { %v290_v25 = vmul.f32 %v287_v24, %v254_v14 }
 0x193   : > { %v568_v26 = vpop.eup %567 }
 0x194   : > { %292 = vadd.xlane.f32.xlu0 %v290_v25  ;;  %v289_v27 = vmul.f32 0.6931472, %v568_v26 }
 0x196   : > { %v291_v28 = vmul.f32 %v289_v27, %v255_v19 }
 0x198   : > { %294 = vadd.xlane.f32.xlu1 %v291_v28 }
 0x20b   : > { %v281_v29 = vpop.xlane.xlu0 %280 }
 0x20c   : > { %v296_v30 = vsub.f32 1.0, %v281_v29 }
 0x20e   : > { %v298_v31 = vmax.f32 %v296_v30, 1e-05 }
 0x20f   : > { %v283_v32 = vpop.xlane.xlu1 %282  ;;  %v273_v33 = vpop.xlane.xlu0 %272 }
 0x210   : > { %569 = vlog2.f32 %v298_v31  ;;  %v297_v34 = vsub.f32 1.0, %v283_v32 }
 0x211   : > { %571 = vrcp.f32 %v273_v33 }
 0x212   : > { %v299_v35 = vmax.f32 %v297_v34, 1e-05 }
 0x213   : > { %v275_v36 = vpop.xlane.xlu1 %274 }
 0x214   : > { %573 = vlog2.f32 %v299_v35 }
 0x215   : > { %575 = vrcp.f32 %v275_v36 }
 0x21d   : > { %v570_v37 = vpop.eup %569  ;;  %v293_v38 = vpop.xlane.xlu0 %292 }
 0x21e   : > { %v572_v39 = vpop.eup %571  ;;  %v301_v40 = vmul.f32 0.6931472, %v570_v37 }
 0x21f   : > { %v305_v41 = vmul.f32 %v572_v39, %v293_v38 }
 0x221   : > { %v574_v42 = vpop.eup %573  ;;  %v308_v43 = vsub.f32 %v301_v40, %v305_v41  ;;  %v295_v44 = vpop.xlane.xlu1 %294 }
 0x222   : > { %v576_v45 = vpop.eup %575  ;;  %v303_v46 = vmul.f32 0.6931472, %v574_v42 }
 0x223   : > { %v310_v47 = vmul.f32 %v308_v43, %v296_v30  ;;  %v307_v48 = vmul.f32 %v576_v45, %v295_v44 }
 0x225   : > { %v312_v49 = vmul.f32 %v310_v47, %v273_v33  ;;  %v309_v50 = vsub.f32 %v303_v46, %v307_v48  ;;  %319 = sbr.rel (%p471_p9) target bundleno = 572 (0x23c), region = 44 }
 0x227   : > { %v311_v51 = vmul.f32 %v309_v50, %v297_v34 }
 0x229   : > { %v313_v52 = vmul.f32 %v311_v51, %v275_v36 }
 0x22a   : > { %v320_v59 = vld [vmem:[%s858_s3] sm:$0x1]  ;;  %vm329_vm1 = vcmask 0  }
 0x22b   : > { %v321_v53 = vadd.f32 %v313_v52, %v312_v49 }
 0x22d   : > { %v322_v54 = vrot.slane %v321_v53, 4 }
 0x22f   : > { %v323_v55 = vadd.f32 %v322_v54, %v321_v53 }
 0x231   : > { %v324_v56 = vrot.slane %v323_v55, 2 }
 0x233   : > { %v325_v57 = vadd.f32 %v324_v56, %v323_v55 }
 0x235   : > { %v326_v58 = vrot.slane %v325_v57, 1 }
 0x237   : > { %v327_v60 = vadd.f32 %v326_v58, %v325_v57 }
 0x239   : > { %v328_v61 = vadd.f32 %v327_v60, %v320_v59 }
 0x23b   : > { %330 = vst.msk [vmem:[%s858_s3] sm:$0x1] %vm329_vm1, %v328_v61 }
 0x23c PF: > { %p472_p6 = scmp.lt.s32.totalorder %s866_s7, 3 }
 0x23d   : > { %s473_s12 = sshll.u32 (!%p472_p6), %s866_s7, 4 }
 0x23e   : > { %334 = sbr.rel (%p472_p6) target bundleno = 606 (0x25e), region = 48 }
 0x243   : > { %v336_v62 = vlaneseq  ;;  %v339_v63 = vstv %s473_s12  ;;  %v346_v12 = vld [vmem:[%s858_s3] sm:$0x1]  ;;  %vm355_vm4 = vcmask 0  }
 0x245   : > { %v337_v0 = vshrl.u32 %v336_v62, 7 }
 0x247   : > { %v338_v1 = vadd.s32 8, %v337_v0  ;;  %v340_v2 = vadd.s32 %v339_v63, %v337_v0 }
 0x249   : > { %v341_v3 = vadd.s32 %v339_v63, %v338_v1  ;;  %vm342_vm2 = vcmp.lt.s32.totalorder %v340_v2, 48 }
 0x24a   : > { %v344_v4 = vsel %vm342_vm2, %v312_v49, 0.0 }
 0x24b   : > { %vm343_vm3 = vcmp.lt.s32.totalorder %v341_v3, 48 }
 0x24c   : > { %v345_v5 = vsel %vm343_vm3, %v313_v52, 0.0 }
 0x24d   : > { %v347_v6 = vadd.f32 %v345_v5, %v344_v4 }
 0x24f   : > { %v348_v7 = vrot.slane %v347_v6, 4 }
 0x251   : > { %v349_v8 = vadd.f32 %v348_v7, %v347_v6 }
 0x253   : > { %v350_v9 = vrot.slane %v349_v8, 2 }
 0x255   : > { %v351_v10 = vadd.f32 %v350_v9, %v349_v8 }
 0x257   : > { %v352_v11 = vrot.slane %v351_v10, 1 }
 0x259   : > { %v353_v13 = vadd.f32 %v352_v11, %v351_v10 }
 0x25b   : > { %v354_v14 = vadd.f32 %v353_v13, %v346_v12 }
 0x25d   : > { %356 = vst.msk [vmem:[%s858_s3] sm:$0x1] %vm355_vm4, %v354_v14 }
 0x25e PF: > { %s18_s16 = sadd.s32 1, %s703_s16   ;;  %s908_s9 = smov %s679_s10 }
 0x25f   : > { %p15_p7 = scmp.ge.s32.totalorder %s18_s16, 6   ;;  %s909_s10 = smov %s683_s11 }
 0x260   : > { %s910_s11 = smov %s803_s6  ;;  %s911_s12 = smov %s695_s14 }
 0x261   : > { %s912_s13 = smov %s699_s15  ;;  %s913_s14 = smov %s916_s18 }
 0x262   : > { %s914_s15 = smov %s920_s19  ;;  %17 = sbr.rel (!%p15_p7) target bundleno = 9 (0x9), region = 93 }
 0x267   :  { %374 = vsyncpa [#allocation3], 1 }
 0x268   :  { %376 = vsyncpa [#allocation3 + $0x1], 1 }
 0x269   :  { %377 = vsyncpa [#allocation5], 1 }
 0x26a   :  { %379 = vsyncpa [#allocation5 + $0x1], 1 }

</bundles_post_ra>
